<compile_context>
chip_gen: v5e
topology: v5e:2x2
jax: 0.10.0
libtpu: 0.0.40
codegen_flags: <defaults>
</compile_context>

<pallas_src>
import numpy as np
import jax
import jax.numpy as jnp
from jax import lax
from jax.experimental import pallas as pl
from jax.experimental.pallas import tpu as pltpu

_LANES = 128
_SUBLANES = 8
_MAX_BLOCK_C = 2048          # lanes per column block (also sets the add-chain ILP)


def _round_up(x, m):
    return ((x + m - 1) // m) * m


def _vmem_capacity_bytes():
    """Per-core VMEM capacity; conservative fallback if the query is unavailable."""
    try:
        return int(pltpu.get_tpu_info().vmem_capacity_bytes)
    except Exception:
        return 64 * 1024 * 1024   # v7x per-core VMEM (smallest of v5e/v6e/v7x)


def _make_kernel(n_rows, n_cols, block_r, block_c, need_row_mask, need_col_mask):
    groups = block_r // _SUBLANES

    def kernel(preds_ref, target_ref, out_ref):
        c = pl.program_id(1)

        @pl.when(c == 0)
        def _():
            out_ref[...] = jnp.zeros_like(out_ref)

        x = preds_ref[...].astype(jnp.float32)
        t = target_ref[...].astype(jnp.float32)

        # Clamp logits to +-100: sigmoid(x) is unchanged in f32, and the logits-form BCE
        # below then matches torch's binary_cross_entropy (which clamps logs at -100).
        xc = jnp.clip(x, -100.0, 100.0)
        e = jnp.exp(-jnp.abs(xc))                              # EUP
        one_plus_e = 1.0 + e
        sp = jnp.maximum(xc, 0.0) + jnp.log(one_plus_e)        # softplus(xc); EUP log
        bce = sp - t * xc                                      # clamped-log BCE, 2 VALU ops
        p = jnp.where(xc >= 0.0, 1.0, e) / one_plus_e          # sigmoid(xc); reuses e

        # Tail masking (only emitted when the block grid does not tile the array exactly).
        mask = None
        if need_row_mask:
            rid = pl.program_id(0) * block_r + lax.broadcasted_iota(
                jnp.int32, (block_r, block_c), 0)
            mask = rid < n_rows
        if need_col_mask:
            cid = c * block_c + lax.broadcasted_iota(
                jnp.int32, (block_r, block_c), 1)
            cmask = cid < n_cols
            mask = cmask if mask is None else (mask & cmask)
        if mask is not None:
            p = jnp.where(mask, p, 0.0)
            bce = jnp.where(mask, bce, 0.0)

        # Layout-preserving reshape (splits the sublane axis by its native tile of 8);
        # the axis-0 sum is block_c/128 independent vreg add chains per stream, and the
        # accumulator lives in the resident output block (written back to HBM once per
        # row block). Cross-lane reduction happens once, in the wrapper.
        out_ref[0, 0, :, :] += jnp.sum(p.reshape(groups, _SUBLANES, block_c), axis=0)
        out_ref[0, 1, :, :] += jnp.sum(bce.reshape(groups, _SUBLANES, block_c), axis=0)

    return kernel


def label_smoothing_loss(preds, target, *, smoothing=0.1):
    """Pallas TPU LabelSmoothingLoss.forward (reduction='mean', weight=None)."""
    assert 0 <= smoothing < 1
    assert preds.shape == target.shape
    # TODO(synk): reduction='sum'/'none' and the optional per-class `weight` are not
    #             implemented (module defaults are reduction='mean', weight=None).
    *lead, n_cols = preds.shape
    n_rows = int(np.prod(lead)) if lead else 1

    # Free reshapes (leading-dim collapse only; no HBM copy, no padding).
    preds2d = preds.reshape(n_rows, n_cols)
    target2d = target.reshape(n_rows, n_cols)

    # ---- Tile selection (per-generation VMEM aware). ----
    itemsize = np.dtype(preds.dtype).itemsize
    vmem_cap = _vmem_capacity_bytes()
    vmem_limit = int(min(vmem_cap * 3 // 4, 96 * 1024 * 1024))
    # ~48 resident bytes per tile element covers 2 inputs x 2 pipeline buffers (f32 worst
    # case) plus the live f32 elementwise intermediates, with headroom under vmem_limit.
    tile_elems = max(_SUBLANES * _LANES, min(2 * 1024 * 1024, vmem_limit // 48))

    block_c = min(_round_up(n_cols, _LANES), _MAX_BLOCK_C)
    n_c = pl.cdiv(n_cols, block_c)

    row_mult = 16 if itemsize < 4 else 8                 # bf16 sublane packing
    block_r = max(row_mult, _round_up(tile_elems // block_c, row_mult))
    block_r = min(block_r, _round_up(n_rows, row_mult))  # don't exceed the array
    n_r = pl.cdiv(n_rows, block_r)
    # Rebalance so edge padding is < row_mult rows and no step streams pure padding.
    block_r = _round_up(pl.cdiv(n_rows, n_r), row_mult)

    need_row_mask = (n_r * block_r) != n_rows
    need_col_mask = (n_c * block_c) != n_cols

    kernel = _make_kernel(n_rows, n_cols, block_r, block_c, need_row_mask, need_col_mask)

    in_spec = pl.BlockSpec((block_r, block_c), lambda r, c: (r, c))
    out_spec = pl.BlockSpec((1, 2, _SUBLANES, block_c), lambda r, c: (r, 0, 0, 0))

    partials = pl.pallas_call(
        kernel,
        out_shape=jax.ShapeDtypeStruct((n_r, 2, _SUBLANES, block_c), jnp.float32),
        grid=(n_r, n_c),
        in_specs=[in_spec, in_spec],
        out_specs=out_spec,
        compiler_params=pltpu.CompilerParams(
            dimension_semantics=("parallel", "arbitrary"),
            vmem_limit_bytes=vmem_limit,
        ),
    )(preds2d, target2d)

    # Tiny cross-lane / cross-block reduction + scalar epilogue (negligible vs the stream).
    sums = jnp.sum(partials, axis=(0, 2, 3))      # (2,): [sum sigmoid, sum bce]
    sig_sum = sums[0]
    bce_sum = sums[1]
    loss_mean = -sig_sum / n_rows                 # mean over batch of -sum over classes
    nll = bce_sum / (n_rows * n_cols)             # BCE with reduction='mean'
    return smoothing * (loss_mean / n_cols) + (1.0 - smoothing) * nll


def _reference(preds, target, smoothing=0.1):
    """Pure-JAX mirror of the PyTorch module (sigmoid + clamped-log BCE)."""
    p = jax.nn.sigmoid(preds.astype(jnp.float32))
    t = target.astype(jnp.float32)
    n = preds.shape[-1]
    loss = jnp.mean(-jnp.sum(p, axis=-1))
    bce = -(t * jnp.maximum(jnp.log(p), -100.0)
            + (1.0 - t) * jnp.maximum(jnp.log(1.0 - p), -100.0))
    nll = jnp.mean(bce)
    return smoothing * (loss / n) + (1.0 - smoothing) * nll


if __name__ == "__main__":
    key = jax.random.PRNGKey(0)
    k1, k2, k3, k4 = jax.random.split(key, 4)

    # Case 1: (batch=8, classes=32) — exercises the column-tail mask (C < 128).
    preds1 = jax.random.normal(k1, (8, 32), dtype=jnp.float32)
    target1 = jax.random.uniform(k2, (8, 32), dtype=jnp.float32)
    out1 = jax.block_until_ready(label_smoothing_loss(preds1, target1, smoothing=0.1))
    ref1 = _reference(preds1, target1, smoothing=0.1)
    np.testing.assert_allclose(np.asarray(out1), np.asarray(ref1), rtol=1e-5, atol=1e-5)

    # Case 2: (batch=2, seq=5, classes=160) — leading-dim collapse + ragged row/col tails.
    preds2 = jax.random.normal(k3, (2, 5, 160), dtype=jnp.float32)
    target2 = jax.random.uniform(k4, (2, 5, 160), dtype=jnp.float32)
    out2 = jax.block_until_ready(label_smoothing_loss(preds2, target2, smoothing=0.1))
    ref2 = _reference(preds2, target2, smoothing=0.1)
    np.testing.assert_allclose(np.asarray(out2), np.asarray(ref2), rtol=1e-5, atol=1e-5)

    print("KERNEL_OK")
</pallas_src>

<mosaic_0001>
module attributes {stable_mosaic.version = 11 : i64} {
  func.func @kernel(%arg0: i32, %arg1: i32, %arg2: memref<8x128xf32, #tpu.memory_space<vmem>>, %arg3: memref<8x128xf32, #tpu.memory_space<vmem>>, %arg4: memref<1x2x8x128xf32, #tpu.memory_space<vmem>>) attributes {dimension_semantics = [#tpu.dimension_semantics<parallel>, #tpu.dimension_semantics<arbitrary>], iteration_bounds = array<i64: 1, 1>, scalar_prefetch = 0 : i64, scratch_operands = 0 : i64, tpu.core_type = #tpu.core_type<tc>, window_params = [{transform_indices = @transform_0, window_bounds = array<i64: 8, 128>}, {transform_indices = @transform_1, window_bounds = array<i64: 8, 128>}, {transform_indices = @transform_2, window_bounds = array<i64: 1, 2, 8, 128>}]} {
    %c0_i32 = arith.constant 0 : i32
    %0 = arith.cmpi eq, %arg1, %c0_i32 : i32
    %1 = arith.extui %0 : i1 to i32
    %c0_i32_0 = arith.constant 0 : i32
    %2 = arith.cmpi ne, %1, %c0_i32_0 : i32
    scf.if %2 {
      %cst_29 = arith.constant 0.000000e+00 : f32
      %52 = vector.broadcast %cst_29 : f32 to vector<1x2x8x128xf32>
      %c0_30 = arith.constant 0 : index
      %c0_31 = arith.constant 0 : index
      %c0_32 = arith.constant 0 : index
      %c0_33 = arith.constant 0 : index
      %53 = vector.load %arg4[%c0_30, %c0_31, %c0_32, %c0_33] : memref<1x2x8x128xf32, #tpu.memory_space<vmem>>, vector<1x2x8x128xf32>
      tpu.vector_store %arg4[%c0_30, %c0_31, %c0_32, %c0_33], %52 {strides = array<i32>} : memref<1x2x8x128xf32, #tpu.memory_space<vmem>>, vector<1x2x8x128xf32>,
    } else {
    }
    %c0 = arith.constant 0 : index
    %c0_1 = arith.constant 0 : index
    %3 = vector.load %arg2[%c0, %c0_1] : memref<8x128xf32, #tpu.memory_space<vmem>>, vector<8x128xf32>
    %c0_2 = arith.constant 0 : index
    %c0_3 = arith.constant 0 : index
    %4 = vector.load %arg3[%c0_2, %c0_3] : memref<8x128xf32, #tpu.memory_space<vmem>>, vector<8x128xf32>
    %cst = arith.constant -1.000000e+02 : f32
    %cst_4 = arith.constant 1.000000e+02 : f32
    %5 = vector.broadcast %cst : f32 to vector<8x128xf32>
    %6 = arith.maximumf %5, %3 : vector<8x128xf32>
    %7 = vector.broadcast %cst_4 : f32 to vector<8x128xf32>
    %8 = arith.minimumf %7, %6 : vector<8x128xf32>
    %9 = math.absf %8 : vector<8x128xf32>
    %cst_5 = arith.constant 0.000000e+00 : f32
    %10 = vector.broadcast %cst_5 : f32 to vector<8x128xf32>
    %11 = arith.subf %10, %9 : vector<8x128xf32>
    %12 = math.exp %11 : vector<8x128xf32>
    %cst_6 = arith.constant 1.000000e+00 : f32
    %13 = vector.broadcast %cst_6 : f32 to vector<8x128xf32>
    %14 = arith.addf %13, %12 : vector<8x128xf32>
    %cst_7 = arith.constant 0.000000e+00 : f32
    %15 = vector.broadcast %cst_7 : f32 to vector<8x128xf32>
    %16 = arith.maximumf %8, %15 : vector<8x128xf32>
    %17 = math.log %14 : vector<8x128xf32>
    %18 = arith.addf %16, %17 : vector<8x128xf32>
    %19 = arith.mulf %4, %8 : vector<8x128xf32>
    %20 = arith.subf %18, %19 : vector<8x128xf32>
    %cst_8 = arith.constant 0.000000e+00 : f32
    %21 = vector.broadcast %cst_8 : f32 to vector<8x128xf32>
    %22 = arith.cmpf oge, %8, %21 : vector<8x128xf32>
    %cst_9 = arith.constant 1.000000e+00 : f32
    %23 = vector.broadcast %cst_9 : f32 to vector<8x128xf32>
    %24 = arith.select %22, %23, %12 : vector<8x128xi1>, vector<8x128xf32>
    %25 = arith.divf %24, %14 : vector<8x128xf32>
    %c128_i32 = arith.constant 128 : i32
    %26 = arith.muli %arg1, %c128_i32 : i32
    %27 = tpu.iota {dimensions = array<i32: 1>} : vector<8x128xi32>
    %28 = vector.broadcast %26 : i32 to vector<8x128xi32>
    %29 = arith.addi %28, %27 : vector<8x128xi32>
    %c32_i32 = arith.constant 32 : i32
    %30 = vector.broadcast %c32_i32 : i32 to vector<8x128xi32>
    %31 = arith.cmpi slt, %29, %30 : vector<8x128xi32>
    %cst_10 = arith.constant 0.000000e+00 : f32
    %32 = vector.broadcast %cst_10 : f32 to vector<8x128xf32>
    %33 = arith.select %31, %25, %32 : vector<8x128xi1>, vector<8x128xf32>
    %cst_11 = arith.constant 0.000000e+00 : f32
    %34 = vector.broadcast %cst_11 : f32 to vector<8x128xf32>
    %35 = arith.select %31, %20, %34 : vector<8x128xi1>, vector<8x128xf32>
    %c0_12 = arith.constant 0 : index
    %c0_13 = arith.constant 0 : index
    %c0_14 = arith.constant 0 : index
    %c0_15 = arith.constant 0 : index
    %36 = vector.load %arg4[%c0_12, %c0_13, %c0_14, %c0_15] : memref<1x2x8x128xf32, #tpu.memory_space<vmem>>, vector<1x1x8x128xf32>
    %37 = vector.shape_cast %36 : vector<1x1x8x128xf32> to vector<8x128xf32>
    %38 = vector.shape_cast %33 : vector<8x128xf32> to vector<1x8x128xf32>
    %cst_16 = arith.constant dense<0.000000e+00> : vector<8x128xf32>
    %39 = vector.multi_reduction <add>, %38, %cst_16 [0] : vector<1x8x128xf32> to vector<8x128xf32>
    %40 = arith.addf %37, %39 : vector<8x128xf32>
    %c0_17 = arith.constant 0 : index
    %c0_18 = arith.constant 0 : index
    %c0_19 = arith.constant 0 : index
    %c0_20 = arith.constant 0 : index
    %41 = vector.load %arg4[%c0_17, %c0_18, %c0_19, %c0_20] : memref<1x2x8x128xf32, #tpu.memory_space<vmem>>, vector<1x1x8x128xf32>
    %42 = vector.shape_cast %41 : vector<1x1x8x128xf32> to vector<8x128xf32>
    %43 = vector.shape_cast %40 : vector<8x128xf32> to vector<1x1x8x128xf32>
    tpu.vector_store %arg4[%c0_17, %c0_18, %c0_19, %c0_20], %43 {strides = array<i32>} : memref<1x2x8x128xf32, #tpu.memory_space<vmem>>, vector<1x1x8x128xf32>,
    %c0_21 = arith.constant 0 : index
    %c1 = arith.constant 1 : index
    %c0_22 = arith.constant 0 : index
    %c0_23 = arith.constant 0 : index
    %44 = vector.load %arg4[%c0_21, %c1, %c0_22, %c0_23] : memref<1x2x8x128xf32, #tpu.memory_space<vmem>>, vector<1x1x8x128xf32>
    %45 = vector.shape_cast %44 : vector<1x1x8x128xf32> to vector<8x128xf32>
    %46 = vector.shape_cast %35 : vector<8x128xf32> to vector<1x8x128xf32>
    %cst_24 = arith.constant dense<0.000000e+00> : vector<8x128xf32>
    %47 = vector.multi_reduction <add>, %46, %cst_24 [0] : vector<1x8x128xf32> to vector<8x128xf32>
    %48 = arith.addf %45, %47 : vector<8x128xf32>
    %c0_25 = arith.constant 0 : index
    %c1_26 = arith.constant 1 : index
    %c0_27 = arith.constant 0 : index
    %c0_28 = arith.constant 0 : index
    %49 = vector.load %arg4[%c0_25, %c1_26, %c0_27, %c0_28] : memref<1x2x8x128xf32, #tpu.memory_space<vmem>>, vector<1x1x8x128xf32>
    %50 = vector.shape_cast %49 : vector<1x1x8x128xf32> to vector<8x128xf32>
    %51 = vector.shape_cast %48 : vector<8x128xf32> to vector<1x1x8x128xf32>
    tpu.vector_store %arg4[%c0_25, %c1_26, %c0_27, %c0_28], %51 {strides = array<i32>} : memref<1x2x8x128xf32, #tpu.memory_space<vmem>>, vector<1x1x8x128xf32>,
    return
  }
  func.func @transform_0(%arg0: i32, %arg1: i32) -> (i32, i32) {
    %c0_i32 = arith.constant 0 : i32
    return %arg0, %arg1 : i32, i32
  }
  func.func @transform_1(%arg0: i32, %arg1: i32) -> (i32, i32) {
    %c0_i32 = arith.constant 0 : i32
    return %arg0, %arg1 : i32, i32
  }
  func.func @transform_2(%arg0: i32, %arg1: i32) -> (i32, i32, i32, i32) {
    %c0_i32 = arith.constant 0 : i32
    %c0_i32_0 = arith.constant 0 : i32
    %c0_i32_1 = arith.constant 0 : i32
    %c0_i32_2 = arith.constant 0 : i32
    return %arg0, %c0_i32, %c0_i32_0, %c0_i32_1 : i32, i32, i32, i32
  }
}

</mosaic_0001>

<bundles_post_ra>
// kernel: tpu_custom_call.1
= control target key start
LH: loop header
LB: loop body
LE: loop exit
PB: predicated region body
PF: predicated region fallthrough
CT: control target
= control target key end

     0   :  { %7 = vsyncpa [#allocation3], 0  ;;  %s235_s0 = inlined_call_operand.hbm [shape: f32[8,32], index: 0, kind: input, shape index: {}]   ;;  %s236_s1 = inlined_call_operand.hbm [shape: f32[8,32], index: 1, kind: input, shape index: {}]   ;;  %s237_s2 = inlined_call_operand.hbm [shape: f32[1,2,8,128], index: 2, kind: output, shape index: {}]  }
   0x1   :  { %8 = vsyncpa [#allocation6], 0 }
   0x2   :  { %9 = vsyncpa [#allocation4], 0  ;;  %s15_s11 = sshll.u32 %s235_s0, 4  ;;  %s206_s12 = smov [#allocation2]   ;;  %s16_s11 = int_to_ptr.hbm [resolvable:$true] %s15_s11 }
   0x3   :  { %s17_s13 = sshll.u32 %s206_s12, 4  ;;  %s26_s16 = sshll.u32 %s236_s1, 4  ;;  %s18_s13 = int_to_ptr.vmem [resolvable:$true] %s17_s13  ;;  %s27_s16 = int_to_ptr.hbm [resolvable:$true] %s26_s16 }
   0x4   :  { %20 = dma.hbm_to_vmem [thread:$0]  %s16_s11, 128, %s18_s13, [#allocation3]  }
   0x5   :  { %s207_s17 = smov [#allocation5]  }
   0x6   :  { %s28_s18 = sshll.u32 %s207_s17, 4  ;;  %s29_s18 = int_to_ptr.vmem [resolvable:$true] %s28_s18 }
   0x7   :  { %31 = dma.hbm_to_vmem [thread:$0]  %s27_s16, 128, %s29_s18, [#allocation6]  }
   0x8   :  { %200 = dma.done.wait [#allocation3], 128  }
   0x9   :  { %201 = vsyncadd [#allocation3], 4294967168 }
   0xa   :  { %202 = dma.done.wait [#allocation6], 128  }
   0xb   :  { %203 = vsyncadd [#allocation6], 4294967168  ;;  %v46_v0 = vld [vmem:[#allocation2] sm:$0xff]  ;;  %v79_v7 = vlaneseq  ;;  %v47_v8 = vld [vmem:[#allocation5] sm:$0xff]  ;;  %s208_s0 = smov [#allocation7]   ;;  %s101_s21 = sshll.u32 %s237_s2, 4  ;;  %s102_s21 = int_to_ptr.hbm [resolvable:$true] %s101_s21 }
   0xc   :  { %v115_v1 = vclamps-f32 %v46_v0, 100.0  ;;  %s99_s1 = sshll.u32 %s208_s0, 4  ;;  %s209_s22 = smov 128   ;;  %s100_s1 = int_to_ptr.vmem [resolvable:$true] %s99_s1 }
   0xd   :  { %v80_v13 = vand.u32 127, %v79_v7  ;;  %s210_s23 = smov 8  }
   0xe   :  { %v50_v2 = vand.u32 2147483647, %v115_v1  ;;  %v55_v10 = vmax.f32 %v115_v1, 0.0  ;;  %v59_v16 = vmul.f32 %v115_v1, %v47_v8  ;;  %vm61_vm2 = vcmp.ge.f32.partialorder %v115_v1, 0.0 }
   0xf   :  { %vm83_vm3 = vcmp.lt.s32.totalorder %v80_v13, 32 }
  0x10   :  { %v51_v3 = vsub.f32 0.0, %v50_v2 }
  0x12   :  { %v52_v4 = vmul.f32 1.442695, %v51_v3 }
  0x14   :  { %122 = vpow2.f32 %v52_v4 }
  0x1a   :  { %v123_v5 = vpop.eup %122 }
  0x1b   :  { %v54_v6 = vadd.f32 1.0, %v123_v5  ;;  %v62_v24 = vsel %vm61_vm2, 1.0, %v123_v5 }
  0x1d   :  { %124 = vrcp.f32 %v54_v6  ;;  %v74_v14 = vand.u32 2147483648, %v54_v6  ;;  %vm68_vm0 = vweird.f32 %v54_v6  ;;  %v72_v18 = vand.u32 2147483647, %v54_v6 }
  0x1e   :  { %126 = vlog2.f32 %v54_v6 }
  0x1f   :  { %v75_v21 = vor.u32 1.1754944e-38, %v74_v14  ;;  %vm73_vm5 = vcmp.eq.f32.partialorder %v72_v18, 8.507059e+37 }
  0x23   :  { %v125_v9 = vpop.eup %124 }
  0x24   :  { %v127_v11 = vpop.eup %126  ;;  %v64_v12 = vmul.f32 %v125_v9, %v54_v6  ;;  %vm69_vm1 = vweird.f32 %v125_v9 }
  0x25   :  { %v57_v15 = vmul.f32 0.6931472, %v127_v11  ;;  %vm70_vm4 = vmor %vm68_vm0, %vm69_vm1 }
  0x26   :  { %v65_v17 = vsub.f32 1.0, %v64_v12 }
  0x27   :  { %v58_v19 = vadd.f32 %v57_v15, %v55_v10 }
  0x28   :  { %v66_v20 = vmul.f32 %v125_v9, %v65_v17 }
  0x29   :  { %v60_v22 = vsub.f32 %v58_v19, %v59_v16 }
  0x2a   :  { %v67_v23 = vadd.f32 %v125_v9, %v66_v20 }
  0x2b   :  { %v85_v25 = vsel %vm83_vm3, %v60_v22, 0.0 }
  0x2c   :  { %v71_v26 = vsel %vm70_vm4, %v125_v9, %v67_v23  ;;  %94 = vst [vmem:[#allocation7 + $0x8] sm:$0xff] %v85_v25 }
  0x2d   :  { %v76_v27 = vsel %vm73_vm5, %v75_v21, %v71_v26 }
  0x2e   :  { %v77_v28 = vmul.f32 %v76_v27, %v62_v24 }
  0x30   :  { %v84_v29 = vsel %vm83_vm3, %v77_v28, 0.0 }
  0x31   :  { %89 = vst [vmem:[#allocation7] sm:$0xff] %v84_v29 }
  0x32   :  { %107 = dma.vmem_to_hbm [thread:$0]  %s100_s1, 256, %s102_s21, [#allocation4], %s209_s22, %s209_s22, %s210_s23  }
  0x33   :  { %204 = dma.done.wait [#allocation4], 256  }
  0x34   :  { %205 = vsyncadd [#allocation4], 4294967040 }
  0x35   :  { %112 = vsyncpa [#allocation3], 1 }
  0x36   :  { %113 = vsyncpa [#allocation6], 1 }
  0x37   :  { %114 = vsyncpa [#allocation4], 1 }

</bundles_post_ra>
